<compile_context>
chip_gen: v7x
topology: tpu7x:2x2x1
jax: 0.10.0
libtpu: 0.0.40
codegen_flags: <defaults>
</compile_context>

<pallas_src>
import math

import jax
import jax.numpy as jnp
from jax.experimental import pallas as pl
from jax.experimental.pallas import tpu as pltpu


def _cdiv(a, b):
    return -(-a // b)


def _round_up(n, m):
    return _cdiv(n, m) * m


def _make_kernel(n_sub, tsub, h, lanes):
    """Fused pipelined nutANN forward for one batch block of n_sub*tsub rows.

    Two VMEM-resident (lanes, lanes) weight tiles carry layers 1-4 (WA) and
    5-8 (WB) in a shifted block-diagonal layout, so one wide matmul advances
    four layer stages; sub-tiles enter at lane-group 0 of the A pipeline and
    their final (layer-8) outputs appear at lane-group 0 of the B pipeline
    seven steps later.
    """
    n_steps = n_sub + 7  # 7 fill/drain steps: sub-tile s finishes at step s+7

    def kernel(x_ref, wa_ref, wb_ref, ba_ref, bb_ref, out_ref):
        # TODO(synk): Dropout(p=0.05) treated as identity (inference semantics).
        wa = wa_ref[...]                                  # (lanes, lanes) bf16
        wb = wb_ref[...]
        ba = ba_ref[...]                                  # (1, lanes) f32
        bb = bb_ref[...]

        lane = jax.lax.broadcasted_iota(jnp.int32, (tsub, lanes), 1)
        grp0 = lane < h                                   # insert / extract lanes
        grp3 = lane >= 3 * h                              # tanh (layer-7) lanes

        a_carry = jnp.zeros((tsub, lanes), jnp.bfloat16)  # post-act, layers 1-4
        b_carry = jnp.zeros((tsub, lanes), jnp.bfloat16)  # post-act, layers 5-8

        for t in range(n_steps):                          # statically unrolled
            if t < n_sub:                                 # feed a new sub-tile
                xin = x_ref[pl.ds(t * tsub, tsub), :]     # (tsub, lanes) bf16
                h_a = jnp.where(grp0, xin, a_carry)
            else:                                         # drain: no new inputs
                h_a = a_carry
            # layer-4 outputs (lane-group 0 of a_carry) hop into the B pipeline
            h_b = jnp.where(grp0, a_carry, b_carry)

            z_a = jnp.dot(h_a, wa, preferred_element_type=jnp.float32) + ba
            z_b = jnp.dot(h_b, wb, preferred_element_type=jnp.float32) + bb

            if t >= 7:                                    # lane-group 0 = layer-8 out
                out_ref[pl.ds((t - 7) * tsub, tsub), :] = z_b[:, :h]

            a_carry = jnp.maximum(z_a, 0.0).astype(jnp.bfloat16)        # relu 1-4
            b_act = jnp.where(grp0, z_b,                                # 8: linear
                              jnp.where(grp3, jnp.tanh(z_b),            # 7: tanh
                                        jnp.maximum(z_b, 0.0)))         # 5,6: relu
            b_carry = b_act.astype(jnp.bfloat16)

    return kernel


def _pack_params(params, h):
    """Shifted block-diagonal packing of the 8 Linear layers into 2 wide tiles."""
    lanes = 4 * h
    wa = jnp.zeros((lanes, lanes), jnp.float32)
    wb = jnp.zeros((lanes, lanes), jnp.float32)
    ba = jnp.zeros((1, lanes), jnp.float32)
    bb = jnp.zeros((1, lanes), jnp.float32)
    for k in range(4):                               # layers 1..4 -> WA
        w, b = params[k]
        rg, cg = k * h, ((k + 1) % 4) * h
        wa = wa.at[rg:rg + w.shape[0], cg:cg + w.shape[1]].set(w)
        ba = ba.at[:, cg:cg + b.shape[1]].set(b)
    for k in range(4):                               # layers 5..8 -> WB
        w, b = params[k + 4]
        rg, cg = k * h, ((k + 1) % 4) * h
        wb = wb.at[rg:rg + w.shape[0], cg:cg + w.shape[1]].set(w)
        bb = bb.at[:, cg:cg + b.shape[1]].set(b)
    return wa.astype(jnp.bfloat16), wb.astype(jnp.bfloat16), ba, bb


def nut_ann_forward(x, params, *, tsub_max=64, max_block_rows=2048):
    """params: 8 (W, b) pairs with W in (in, out) layout, b in (1, out), f32."""
    B, D_in = x.shape
    H = params[0][0].shape[1]
    D_out = params[-1][0].shape[1]
    lanes = 4 * H
    assert len(params) == 8
    assert D_in <= H and D_out <= H, "packing assumes D_in <= H and D_out <= H"

    wa, wb, ba, bb = _pack_params(params, H)

    # --- batch tiling plan (minimal padding, grid >= 2 for v7x megacore) ------
    tsub = min(tsub_max, _round_up(max(B, 1), 16))   # sub-tile rows (bf16 sublanes)
    n_sub_total = _cdiv(B, tsub)
    max_sub_per_block = max(1, max_block_rows // tsub)
    grid_n = max(_cdiv(n_sub_total, max_sub_per_block),
                 2 if n_sub_total >= 2 else 1)
    n_sub = _cdiv(n_sub_total, grid_n)               # sub-tiles per grid block
    grid_n = _cdiv(n_sub_total, n_sub)
    block_rows = n_sub * tsub
    b_pad = grid_n * block_rows

    # Input slab: features in lane-group 0, zeros elsewhere; bf16 MXU feed.
    xp = (jnp.zeros((b_pad, lanes), jnp.bfloat16)
          .at[:B, :D_in].set(x.astype(jnp.bfloat16)))

    steps = grid_n * (n_sub + 7)
    cost = pl.CostEstimate(
        flops=steps * 2 * (2 * tsub * lanes * lanes),
        transcendentals=steps * tsub * lanes,
        bytes_accessed=(xp.size * 2 + wa.size * 2 + wb.size * 2
                        + ba.size * 4 + bb.size * 4 + b_pad * H * 4))

    out = pl.pallas_call(
        _make_kernel(n_sub, tsub, H, lanes),
        out_shape=jax.ShapeDtypeStruct((b_pad, H), jnp.float32),
        grid=(grid_n,),
        in_specs=[
            pl.BlockSpec((block_rows, lanes), lambda i: (i, 0)),   # x: streamed
            pl.BlockSpec((lanes, lanes), lambda i: (0, 0)),        # WA: resident
            pl.BlockSpec((lanes, lanes), lambda i: (0, 0)),        # WB: resident
            pl.BlockSpec((1, lanes), lambda i: (0, 0)),            # bA: resident
            pl.BlockSpec((1, lanes), lambda i: (0, 0)),            # bB: resident
        ],
        out_specs=pl.BlockSpec((block_rows, H), lambda i: (i, 0)),
        compiler_params=pltpu.CompilerParams(
            dimension_semantics=("parallel",)),                    # v7x: 2 TCs
        cost_estimate=cost,
    )(xp, wa, wb, ba, bb)

    return out[:B, :D_out]


def init_params(key, D_in, H, D_out):
    """Matches nutANN.__init__ / initialize_weight:
    weights ~ kaiming_uniform_ (a=0, fan_in -> bound = sqrt(6 / fan_in)),
    biases  ~ PyTorch Linear default U(-1/sqrt(fan_in), 1/sqrt(fan_in))."""
    dims = [(D_in, H), (H, H), (H, H), (H, H), (H, H), (H, H), (H, H), (H, D_out)]
    params = []
    for (fan_in, fan_out) in dims:
        key, kw, kb = jax.random.split(key, 3)
        w_bound = math.sqrt(6.0 / fan_in)
        b_bound = 1.0 / math.sqrt(fan_in)
        w = jax.random.uniform(kw, (fan_in, fan_out), jnp.float32,
                               minval=-w_bound, maxval=w_bound)   # stored (in, out)
        b = jax.random.uniform(kb, (1, fan_out), jnp.float32,
                               minval=-b_bound, maxval=b_bound)
        params.append((w, b))
    return params


def reference_forward(x, params):
    """Pure-JAX reference mirroring the kernel numerics (bf16 MXU inputs, f32 math)."""
    h = x.astype(jnp.float32)
    for i, (w, b) in enumerate(params):
        z = jnp.dot(h.astype(jnp.bfloat16), w.astype(jnp.bfloat16),
                    preferred_element_type=jnp.float32) + b
        if i < 6:
            h = jnp.maximum(z, 0.0)
        elif i == 6:
            h = jnp.tanh(z)
        else:
            h = z
    return h


if __name__ == "__main__":
    D_in, H, D_out = 16, 32, 4
    key = jax.random.PRNGKey(0)
    kp, kx, kx2 = jax.random.split(key, 3)
    params = init_params(kp, D_in, H, D_out)

    # Small batch: one 16-row sub-tile, grid = (1,).
    x = jax.random.normal(kx, (8, D_in), jnp.float32)
    out = jax.block_until_ready(nut_ann_forward(x, params))
    ref = reference_forward(x, params)
    assert out.shape == (8, D_out)
    assert jnp.allclose(out, ref, atol=2e-2, rtol=2e-2), "mismatch vs reference (B=8)"

    # Larger batch: 10 sub-tiles of 64 rows, grid = (2,), pads 600 -> 640 rows.
    x2 = jax.random.normal(kx2, (600, D_in), jnp.float32)
    out2 = jax.block_until_ready(nut_ann_forward(x2, params))
    ref2 = reference_forward(x2, params)
    assert out2.shape == (600, D_out)
    assert jnp.allclose(out2, ref2, atol=2e-2, rtol=2e-2), "mismatch vs reference (B=600)"

    print("KERNEL_OK")
</pallas_src>

<mosaic_0001>
module attributes {stable_mosaic.version = 11 : i64} {
  func.func @kernel(%arg0: i32, %arg1: memref<16x128xbf16, #tpu.memory_space<vmem>>, %arg2: memref<128x128xbf16, #tpu.memory_space<vmem>>, %arg3: memref<128x128xbf16, #tpu.memory_space<vmem>>, %arg4: memref<1x128xf32, #tpu.memory_space<vmem>>, %arg5: memref<1x128xf32, #tpu.memory_space<vmem>>, %arg6: memref<16x32xf32, #tpu.memory_space<vmem>>) attributes {dimension_semantics = [#tpu.dimension_semantics<parallel>], iteration_bounds = array<i64: 1>, scalar_prefetch = 0 : i64, scratch_operands = 0 : i64, tpu.core_type = #tpu.core_type<tc>, window_params = [{transform_indices = @transform_0, window_bounds = array<i64: 16, 128>}, {pipeline_mode = #tpu.pipeline_mode<synchronous>, transform_indices = @transform_1, window_bounds = array<i64: 128, 128>}, {pipeline_mode = #tpu.pipeline_mode<synchronous>, transform_indices = @transform_2, window_bounds = array<i64: 128, 128>}, {pipeline_mode = #tpu.pipeline_mode<synchronous>, transform_indices = @transform_3, window_bounds = array<i64: 1, 128>}, {pipeline_mode = #tpu.pipeline_mode<synchronous>, transform_indices = @transform_4, window_bounds = array<i64: 1, 128>}, {transform_indices = @transform_5, window_bounds = array<i64: 16, 32>}]} {
    %c0 = arith.constant 0 : index
    %c0_0 = arith.constant 0 : index
    %0 = vector.load %arg2[%c0, %c0_0] : memref<128x128xbf16, #tpu.memory_space<vmem>>, vector<128x128xbf16>
    %c0_1 = arith.constant 0 : index
    %c0_2 = arith.constant 0 : index
    %1 = vector.load %arg3[%c0_1, %c0_2] : memref<128x128xbf16, #tpu.memory_space<vmem>>, vector<128x128xbf16>
    %c0_3 = arith.constant 0 : index
    %c0_4 = arith.constant 0 : index
    %2 = vector.load %arg4[%c0_3, %c0_4] : memref<1x128xf32, #tpu.memory_space<vmem>>, vector<1x128xf32>
    %c0_5 = arith.constant 0 : index
    %c0_6 = arith.constant 0 : index
    %3 = vector.load %arg5[%c0_5, %c0_6] : memref<1x128xf32, #tpu.memory_space<vmem>>, vector<1x128xf32>
    %4 = tpu.iota {dimensions = array<i32: 1>} : vector<16x128xi32>
    %c32_i32 = arith.constant 32 : i32
    %5 = vector.broadcast %c32_i32 : i32 to vector<16x128xi32>
    %6 = arith.cmpi slt, %4, %5 : vector<16x128xi32>
    %c96_i32 = arith.constant 96 : i32
    %7 = vector.broadcast %c96_i32 : i32 to vector<16x128xi32>
    %8 = arith.cmpi sge, %4, %7 : vector<16x128xi32>
    %cst = arith.constant 0.000000e+00 : bf16
    %9 = vector.broadcast %cst : bf16 to vector<16x128xbf16>
    %cst_7 = arith.constant 0.000000e+00 : bf16
    %10 = vector.broadcast %cst_7 : bf16 to vector<16x128xbf16>
    %c0_8 = arith.constant 0 : index
    %c0_9 = arith.constant 0 : index
    %11 = vector.load %arg1[%c0_8, %c0_9] : memref<16x128xbf16, #tpu.memory_space<vmem>>, vector<16x128xbf16>
    %12 = arith.select %6, %11, %9 : vector<16x128xi1>, vector<16x128xbf16>
    %13 = arith.select %6, %9, %10 : vector<16x128xi1>, vector<16x128xbf16>
    %cst_10 = arith.constant dense<0.000000e+00> : vector<16x128xf32>
    %14 = tpu.matmul %12, %0, %cst_10 {dimension_numbers = #tpu.dot_dimension_numbers<[1], [0], [0], [1], [0, 0, 1, 1], [], []>} : vector<16x128xbf16>, vector<128x128xbf16>, vector<16x128xf32> -> vector<16x128xf32>
    %15 = vector.broadcast %2 : vector<1x128xf32> to vector<16x128xf32>
    %16 = arith.addf %14, %15 : vector<16x128xf32>
    %cst_11 = arith.constant dense<0.000000e+00> : vector<16x128xf32>
    %17 = tpu.matmul %13, %1, %cst_11 {dimension_numbers = #tpu.dot_dimension_numbers<[1], [0], [0], [1], [0, 0, 1, 1], [], []>} : vector<16x128xbf16>, vector<128x128xbf16>, vector<16x128xf32> -> vector<16x128xf32>
    %18 = vector.broadcast %3 : vector<1x128xf32> to vector<16x128xf32>
    %19 = arith.addf %17, %18 : vector<16x128xf32>
    %cst_12 = arith.constant 0.000000e+00 : f32
    %20 = vector.broadcast %cst_12 : f32 to vector<16x128xf32>
    %21 = arith.maximumf %16, %20 : vector<16x128xf32>
    %22 = arith.truncf %21 : vector<16x128xf32> to vector<16x128xbf16>
    %23 = math.tanh %19 : vector<16x128xf32>
    %cst_13 = arith.constant 0.000000e+00 : f32
    %24 = vector.broadcast %cst_13 : f32 to vector<16x128xf32>
    %25 = arith.maximumf %19, %24 : vector<16x128xf32>
    %26 = arith.select %8, %23, %25 : vector<16x128xi1>, vector<16x128xf32>
    %27 = arith.select %6, %19, %26 : vector<16x128xi1>, vector<16x128xf32>
    %28 = arith.truncf %27 : vector<16x128xf32> to vector<16x128xbf16>
    %29 = arith.select %6, %22, %28 : vector<16x128xi1>, vector<16x128xbf16>
    %cst_14 = arith.constant dense<0.000000e+00> : vector<16x128xf32>
    %30 = tpu.matmul %22, %0, %cst_14 {dimension_numbers = #tpu.dot_dimension_numbers<[1], [0], [0], [1], [0, 0, 1, 1], [], []>} : vector<16x128xbf16>, vector<128x128xbf16>, vector<16x128xf32> -> vector<16x128xf32>
    %31 = vector.broadcast %2 : vector<1x128xf32> to vector<16x128xf32>
    %32 = arith.addf %30, %31 : vector<16x128xf32>
    %cst_15 = arith.constant dense<0.000000e+00> : vector<16x128xf32>
    %33 = tpu.matmul %29, %1, %cst_15 {dimension_numbers = #tpu.dot_dimension_numbers<[1], [0], [0], [1], [0, 0, 1, 1], [], []>} : vector<16x128xbf16>, vector<128x128xbf16>, vector<16x128xf32> -> vector<16x128xf32>
    %34 = vector.broadcast %3 : vector<1x128xf32> to vector<16x128xf32>
    %35 = arith.addf %33, %34 : vector<16x128xf32>
    %cst_16 = arith.constant 0.000000e+00 : f32
    %36 = vector.broadcast %cst_16 : f32 to vector<16x128xf32>
    %37 = arith.maximumf %32, %36 : vector<16x128xf32>
    %38 = arith.truncf %37 : vector<16x128xf32> to vector<16x128xbf16>
    %39 = math.tanh %35 : vector<16x128xf32>
    %cst_17 = arith.constant 0.000000e+00 : f32
    %40 = vector.broadcast %cst_17 : f32 to vector<16x128xf32>
    %41 = arith.maximumf %35, %40 : vector<16x128xf32>
    %42 = arith.select %8, %39, %41 : vector<16x128xi1>, vector<16x128xf32>
    %43 = arith.select %6, %35, %42 : vector<16x128xi1>, vector<16x128xf32>
    %44 = arith.truncf %43 : vector<16x128xf32> to vector<16x128xbf16>
    %45 = arith.select %6, %38, %44 : vector<16x128xi1>, vector<16x128xbf16>
    %cst_18 = arith.constant dense<0.000000e+00> : vector<16x128xf32>
    %46 = tpu.matmul %38, %0, %cst_18 {dimension_numbers = #tpu.dot_dimension_numbers<[1], [0], [0], [1], [0, 0, 1, 1], [], []>} : vector<16x128xbf16>, vector<128x128xbf16>, vector<16x128xf32> -> vector<16x128xf32>
    %47 = vector.broadcast %2 : vector<1x128xf32> to vector<16x128xf32>
    %48 = arith.addf %46, %47 : vector<16x128xf32>
    %cst_19 = arith.constant dense<0.000000e+00> : vector<16x128xf32>
    %49 = tpu.matmul %45, %1, %cst_19 {dimension_numbers = #tpu.dot_dimension_numbers<[1], [0], [0], [1], [0, 0, 1, 1], [], []>} : vector<16x128xbf16>, vector<128x128xbf16>, vector<16x128xf32> -> vector<16x128xf32>
    %50 = vector.broadcast %3 : vector<1x128xf32> to vector<16x128xf32>
    %51 = arith.addf %49, %50 : vector<16x128xf32>
    %cst_20 = arith.constant 0.000000e+00 : f32
    %52 = vector.broadcast %cst_20 : f32 to vector<16x128xf32>
    %53 = arith.maximumf %48, %52 : vector<16x128xf32>
    %54 = arith.truncf %53 : vector<16x128xf32> to vector<16x128xbf16>
    %55 = math.tanh %51 : vector<16x128xf32>
    %cst_21 = arith.constant 0.000000e+00 : f32
    %56 = vector.broadcast %cst_21 : f32 to vector<16x128xf32>
    %57 = arith.maximumf %51, %56 : vector<16x128xf32>
    %58 = arith.select %8, %55, %57 : vector<16x128xi1>, vector<16x128xf32>
    %59 = arith.select %6, %51, %58 : vector<16x128xi1>, vector<16x128xf32>
    %60 = arith.truncf %59 : vector<16x128xf32> to vector<16x128xbf16>
    %61 = arith.select %6, %54, %60 : vector<16x128xi1>, vector<16x128xbf16>
    %cst_22 = arith.constant dense<0.000000e+00> : vector<16x128xf32>
    %62 = tpu.matmul %54, %0, %cst_22 {dimension_numbers = #tpu.dot_dimension_numbers<[1], [0], [0], [1], [0, 0, 1, 1], [], []>} : vector<16x128xbf16>, vector<128x128xbf16>, vector<16x128xf32> -> vector<16x128xf32>
    %63 = vector.broadcast %2 : vector<1x128xf32> to vector<16x128xf32>
    %64 = arith.addf %62, %63 : vector<16x128xf32>
    %cst_23 = arith.constant dense<0.000000e+00> : vector<16x128xf32>
    %65 = tpu.matmul %61, %1, %cst_23 {dimension_numbers = #tpu.dot_dimension_numbers<[1], [0], [0], [1], [0, 0, 1, 1], [], []>} : vector<16x128xbf16>, vector<128x128xbf16>, vector<16x128xf32> -> vector<16x128xf32>
    %66 = vector.broadcast %3 : vector<1x128xf32> to vector<16x128xf32>
    %67 = arith.addf %65, %66 : vector<16x128xf32>
    %cst_24 = arith.constant 0.000000e+00 : f32
    %68 = vector.broadcast %cst_24 : f32 to vector<16x128xf32>
    %69 = arith.maximumf %64, %68 : vector<16x128xf32>
    %70 = arith.truncf %69 : vector<16x128xf32> to vector<16x128xbf16>
    %71 = math.tanh %67 : vector<16x128xf32>
    %cst_25 = arith.constant 0.000000e+00 : f32
    %72 = vector.broadcast %cst_25 : f32 to vector<16x128xf32>
    %73 = arith.maximumf %67, %72 : vector<16x128xf32>
    %74 = arith.select %8, %71, %73 : vector<16x128xi1>, vector<16x128xf32>
    %75 = arith.select %6, %67, %74 : vector<16x128xi1>, vector<16x128xf32>
    %76 = arith.truncf %75 : vector<16x128xf32> to vector<16x128xbf16>
    %77 = arith.select %6, %70, %76 : vector<16x128xi1>, vector<16x128xbf16>
    %cst_26 = arith.constant dense<0.000000e+00> : vector<16x128xf32>
    %78 = tpu.matmul %70, %0, %cst_26 {dimension_numbers = #tpu.dot_dimension_numbers<[1], [0], [0], [1], [0, 0, 1, 1], [], []>} : vector<16x128xbf16>, vector<128x128xbf16>, vector<16x128xf32> -> vector<16x128xf32>
    %79 = vector.broadcast %2 : vector<1x128xf32> to vector<16x128xf32>
    %80 = arith.addf %78, %79 : vector<16x128xf32>
    %cst_27 = arith.constant dense<0.000000e+00> : vector<16x128xf32>
    %81 = tpu.matmul %77, %1, %cst_27 {dimension_numbers = #tpu.dot_dimension_numbers<[1], [0], [0], [1], [0, 0, 1, 1], [], []>} : vector<16x128xbf16>, vector<128x128xbf16>, vector<16x128xf32> -> vector<16x128xf32>
    %82 = vector.broadcast %3 : vector<1x128xf32> to vector<16x128xf32>
    %83 = arith.addf %81, %82 : vector<16x128xf32>
    %cst_28 = arith.constant 0.000000e+00 : f32
    %84 = vector.broadcast %cst_28 : f32 to vector<16x128xf32>
    %85 = arith.maximumf %80, %84 : vector<16x128xf32>
    %86 = arith.truncf %85 : vector<16x128xf32> to vector<16x128xbf16>
    %87 = math.tanh %83 : vector<16x128xf32>
    %cst_29 = arith.constant 0.000000e+00 : f32
    %88 = vector.broadcast %cst_29 : f32 to vector<16x128xf32>
    %89 = arith.maximumf %83, %88 : vector<16x128xf32>
    %90 = arith.select %8, %87, %89 : vector<16x128xi1>, vector<16x128xf32>
    %91 = arith.select %6, %83, %90 : vector<16x128xi1>, vector<16x128xf32>
    %92 = arith.truncf %91 : vector<16x128xf32> to vector<16x128xbf16>
    %93 = arith.select %6, %86, %92 : vector<16x128xi1>, vector<16x128xbf16>
    %cst_30 = arith.constant dense<0.000000e+00> : vector<16x128xf32>
    %94 = tpu.matmul %86, %0, %cst_30 {dimension_numbers = #tpu.dot_dimension_numbers<[1], [0], [0], [1], [0, 0, 1, 1], [], []>} : vector<16x128xbf16>, vector<128x128xbf16>, vector<16x128xf32> -> vector<16x128xf32>
    %95 = vector.broadcast %2 : vector<1x128xf32> to vector<16x128xf32>
    %96 = arith.addf %94, %95 : vector<16x128xf32>
    %cst_31 = arith.constant dense<0.000000e+00> : vector<16x128xf32>
    %97 = tpu.matmul %93, %1, %cst_31 {dimension_numbers = #tpu.dot_dimension_numbers<[1], [0], [0], [1], [0, 0, 1, 1], [], []>} : vector<16x128xbf16>, vector<128x128xbf16>, vector<16x128xf32> -> vector<16x128xf32>
    %98 = vector.broadcast %3 : vector<1x128xf32> to vector<16x128xf32>
    %99 = arith.addf %97, %98 : vector<16x128xf32>
    %cst_32 = arith.constant 0.000000e+00 : f32
    %100 = vector.broadcast %cst_32 : f32 to vector<16x128xf32>
    %101 = arith.maximumf %96, %100 : vector<16x128xf32>
    %102 = arith.truncf %101 : vector<16x128xf32> to vector<16x128xbf16>
    %103 = math.tanh %99 : vector<16x128xf32>
    %cst_33 = arith.constant 0.000000e+00 : f32
    %104 = vector.broadcast %cst_33 : f32 to vector<16x128xf32>
    %105 = arith.maximumf %99, %104 : vector<16x128xf32>
    %106 = arith.select %8, %103, %105 : vector<16x128xi1>, vector<16x128xf32>
    %107 = arith.select %6, %99, %106 : vector<16x128xi1>, vector<16x128xf32>
    %108 = arith.truncf %107 : vector<16x128xf32> to vector<16x128xbf16>
    %109 = arith.select %6, %102, %108 : vector<16x128xi1>, vector<16x128xbf16>
    %cst_34 = arith.constant dense<0.000000e+00> : vector<16x128xf32>
    %110 = tpu.matmul %102, %0, %cst_34 {dimension_numbers = #tpu.dot_dimension_numbers<[1], [0], [0], [1], [0, 0, 1, 1], [], []>} : vector<16x128xbf16>, vector<128x128xbf16>, vector<16x128xf32> -> vector<16x128xf32>
    %111 = vector.broadcast %2 : vector<1x128xf32> to vector<16x128xf32>
    %112 = arith.addf %110, %111 : vector<16x128xf32>
    %cst_35 = arith.constant dense<0.000000e+00> : vector<16x128xf32>
    %113 = tpu.matmul %109, %1, %cst_35 {dimension_numbers = #tpu.dot_dimension_numbers<[1], [0], [0], [1], [0, 0, 1, 1], [], []>} : vector<16x128xbf16>, vector<128x128xbf16>, vector<16x128xf32> -> vector<16x128xf32>
    %114 = vector.broadcast %3 : vector<1x128xf32> to vector<16x128xf32>
    %115 = arith.addf %113, %114 : vector<16x128xf32>
    %cst_36 = arith.constant 0.000000e+00 : f32
    %116 = vector.broadcast %cst_36 : f32 to vector<16x128xf32>
    %117 = arith.maximumf %112, %116 : vector<16x128xf32>
    %118 = arith.truncf %117 : vector<16x128xf32> to vector<16x128xbf16>
    %119 = math.tanh %115 : vector<16x128xf32>
    %cst_37 = arith.constant 0.000000e+00 : f32
    %120 = vector.broadcast %cst_37 : f32 to vector<16x128xf32>
    %121 = arith.maximumf %115, %120 : vector<16x128xf32>
    %122 = arith.select %8, %119, %121 : vector<16x128xi1>, vector<16x128xf32>
    %123 = arith.select %6, %115, %122 : vector<16x128xi1>, vector<16x128xf32>
    %124 = arith.truncf %123 : vector<16x128xf32> to vector<16x128xbf16>
    %125 = arith.select %6, %118, %124 : vector<16x128xi1>, vector<16x128xbf16>
    %cst_38 = arith.constant dense<0.000000e+00> : vector<16x128xf32>
    %126 = tpu.matmul %125, %1, %cst_38 {dimension_numbers = #tpu.dot_dimension_numbers<[1], [0], [0], [1], [0, 0, 1, 1], [], []>} : vector<16x128xbf16>, vector<128x128xbf16>, vector<16x128xf32> -> vector<16x128xf32>
    %127 = vector.broadcast %3 : vector<1x128xf32> to vector<16x128xf32>
    %128 = arith.addf %126, %127 : vector<16x128xf32>
    %129 = vector.extract_strided_slice %128 {offsets = [0, 0], sizes = [16, 32], strides = [1, 1]} : vector<16x128xf32> to vector<16x32xf32>
    %c0_39 = arith.constant 0 : index
    %c0_40 = arith.constant 0 : index
    %130 = vector.load %arg6[%c0_39, %c0_40] : memref<16x32xf32, #tpu.memory_space<vmem>>, vector<16x32xf32>
    tpu.vector_store %arg6[%c0_39, %c0_40], %129 {strides = array<i32>} : memref<16x32xf32, #tpu.memory_space<vmem>>, vector<16x32xf32>,
    return
  }
  func.func @transform_0(%arg0: i32) -> (i32, i32) {
    %c0_i32 = arith.constant 0 : i32
    %c0_i32_0 = arith.constant 0 : i32
    return %arg0, %c0_i32 : i32, i32
  }
  func.func @transform_1(%arg0: i32) -> (i32, i32) {
    %c0_i32 = arith.constant 0 : i32
    %c0_i32_0 = arith.constant 0 : i32
    %c0_i32_1 = arith.constant 0 : i32
    return %c0_i32, %c0_i32_0 : i32, i32
  }
  func.func @transform_2(%arg0: i32) -> (i32, i32) {
    %c0_i32 = arith.constant 0 : i32
    %c0_i32_0 = arith.constant 0 : i32
    %c0_i32_1 = arith.constant 0 : i32
    return %c0_i32, %c0_i32_0 : i32, i32
  }
  func.func @transform_3(%arg0: i32) -> (i32, i32) {
    %c0_i32 = arith.constant 0 : i32
    %c0_i32_0 = arith.constant 0 : i32
    %c0_i32_1 = arith.constant 0 : i32
    return %c0_i32, %c0_i32_0 : i32, i32
  }
  func.func @transform_4(%arg0: i32) -> (i32, i32) {
    %c0_i32 = arith.constant 0 : i32
    %c0_i32_0 = arith.constant 0 : i32
    %c0_i32_1 = arith.constant 0 : i32
    return %c0_i32, %c0_i32_0 : i32, i32
  }
  func.func @transform_5(%arg0: i32) -> (i32, i32) {
    %c0_i32 = arith.constant 0 : i32
    %c0_i32_0 = arith.constant 0 : i32
    return %arg0, %c0_i32 : i32, i32
  }
}

</mosaic_0001>

<bundles_post_ra>
// kernel: tpu_custom_call.1
= control target key start
LH: loop header
LB: loop body
LE: loop exit
PB: predicated region body
PF: predicated region fallthrough
CT: control target
= control target key end

     0   :  { %10 = vsyncpa [#allocation3], 0  ;;  %s2095_s0 = inlined_call_operand.hbm [shape: bf16[16,128], index: 0, kind: input, shape index: {}]   ;;  %s2096_s1 = inlined_call_operand.hbm [shape: bf16[128,128], index: 1, kind: input, shape index: {}]   ;;  %s2097_s2 = inlined_call_operand.hbm [shape: bf16[128,128], index: 2, kind: input, shape index: {}]   ;;  %s2098_s3 = inlined_call_operand.vmem [shape: f32[1,128], index: 3, kind: input, shape index: {}]   ;;  %s2099_s4 = inlined_call_operand.vmem [shape: f32[1,128], index: 4, kind: input, shape index: {}]   ;;  %s2100_s5 = inlined_call_operand.hbm [shape: f32[16,32], index: 5, kind: output, shape index: {}]  }
   0x1   :  { %11 = vsyncpa [#allocation6], 0 }
   0x2   :  { %12 = vsyncpa [#allocation4], 0  ;;  %s1558_s18 = smov [#allocation5]   ;;  %s1559_s20 = smov [#allocation2]  }
   0x3   :  { %s30_s19 = sshll.u32 %s1558_s18, 4  ;;  %s18_s21 = sshll.u32 %s1559_s20, 4  ;;  %s31_s19 = int_to_ptr.vmem [resolvable:$true] %s30_s19  ;;  %s1599_s21 = int_to_ptr.vmem [resolvable:$true] %s18_s21 }
   0x4   :  { %s1464_s24 = scalar_lea.hbm %s2096_s1, 1024 }
   0x5   :  { %p1465_p0 = scmp.ne.s32.totalorder %s2096_s1, %s1464_s24  ;;  %p1468_p1 = scmp.lt.u32.totalorder %s1464_s24, %s2096_s1 }
   0x7   :  { %p1470_p2 = pnand %p1468_p1, %p1465_p0 }
   0x9   :  { %1473 = shalt.err (!%p1470_p2)
}
   0xa   :  { %s1474_s29 = scalar_lea.vmem %s31_s19, 1024  ;;  %p1479_p4 = scmp.lt.s32.totalorder %s31_s19, %s31_s19 }
   0xb   :  { %p1475_p3 = scmp.ne.s32.totalorder %s31_s19, %s1474_s29  ;;  %p1480_p5 = scmp.lt.s32.totalorder %s1474_s29, %s1474_s29 }
   0xd   :  { %p1481_p6 = por %p1480_p5, %p1479_p4 }
   0xf   :  { %p1482_p7 = pnand %p1481_p6, %p1475_p3 }
  0x11   :  { %1485 = shalt.err (!%p1482_p7)
}
  0x12   :  { %s1560_s30 = smov 64   ;;  %s1561_s6 = smov 4  }
  0x13   :  { %36 = dma.hbm_to_vmem [thread:$0]  %s2096_s1, 1024, %s31_s19, [#allocation6], %s1560_s30, %s1560_s30, %s1561_s6  }
  0x14   :  { %s1486_s11 = scalar_lea.hbm %s2095_s0, 128 }
  0x15   :  { %p1487_p8 = scmp.ne.s32.totalorder %s2095_s0, %s1486_s11  ;;  %p1490_p9 = scmp.lt.u32.totalorder %s1486_s11, %s2095_s0 }
  0x17   :  { %p1492_p10 = pnand %p1490_p9, %p1487_p8 }
  0x19   :  { %1495 = shalt.err (!%p1492_p10)
}
  0x1a   :  { %s1496_s16 = scalar_lea.vmem %s1599_s21, 128  ;;  %p1501_p12 = scmp.lt.s32.totalorder %s1599_s21, %s1599_s21 }
  0x1b   :  { %p1497_p11 = scmp.ne.s32.totalorder %s1599_s21, %s1496_s16  ;;  %p1502_p13 = scmp.lt.s32.totalorder %s1496_s16, %s1496_s16 }
  0x1d   :  { %p1503_p0 = por %p1502_p13, %p1501_p12 }
  0x1f   :  { %p1504_p1 = pnand %p1503_p0, %p1497_p11 }
  0x21   :  { %1507 = shalt.err (!%p1504_p1)
}
  0x22   :  { %24 = dma.hbm_to_vmem [thread:$0]  %s2095_s0, 128, %s1599_s21, [#allocation3], %s1560_s30, %s1560_s30, %s1561_s6  }
  0x23   :  { %s1562_s18 = smov [#allocation7]   ;;  %s1508_s23 = scalar_lea.hbm %s2097_s2, 1024 }
  0x24   :  { %s42_s19 = sshll.u32 %s1562_s18, 4  ;;  %p1509_p2 = scmp.ne.s32.totalorder %s2097_s2, %s1508_s23  ;;  %s43_s19 = int_to_ptr.vmem [resolvable:$true] %s42_s19 }
  0x25   :  { %p1512_p3 = scmp.lt.u32.totalorder %s1508_s23, %s2097_s2 }
  0x27   :  { %p1514_p4 = pnand %p1512_p3, %p1509_p2 }
  0x29   :  { %1517 = shalt.err (!%p1514_p4)
}
  0x2a   :  { %s1518_s28 = scalar_lea.vmem %s43_s19, 1024  ;;  %p1523_p6 = scmp.lt.s32.totalorder %s43_s19, %s43_s19 }
  0x2b   :  { %p1519_p5 = scmp.ne.s32.totalorder %s43_s19, %s1518_s28  ;;  %p1524_p7 = scmp.lt.s32.totalorder %s1518_s28, %s1518_s28 }
  0x2d   :  { %p1525_p8 = por %p1524_p7, %p1523_p6 }
  0x2f   :  { %p1526_p9 = pnand %p1525_p8, %p1519_p5 }
  0x31   :  { %1529 = shalt.err (!%p1526_p9)
}
  0x32   :  { %48 = dma.hbm_to_vmem [thread:$0]  %s2097_s2, 1024, %s43_s19, [#allocation6], %s1560_s30, %s1560_s30, %s1561_s6  }
  0x33   :  { %1552 = dma.done.wait [#allocation3], 128  }
  0x34   :  { %1553 = vsyncadd [#allocation3], 4294967168 }
  0x35   :  { %1554 = dma.done.wait [#allocation6], 2048  }
  0x36   :  { %1555 = vsyncadd [#allocation6], 4294965248  ;;  %v99_v0 = vlaneseq  ;;  %v1563_v1 = vmov 0.0   ;;  %vm1564_vm0 = vmmov 0   ;;  %v1565_v6 = vmov 0   ;;  %v1669_v8 = vld [vmem:[#allocation5] sm:$0xff]  }
  0x37   :  { %1109 = vmatprep.subr.bf16.mxu0 %v1563_v1  ;;  %1129 = vmatprep.subr.bf16.mxu1 %v1563_v1  ;;  %v1673_v10 = vld [vmem:[#allocation7] sm:$0xff]   ;;  %v1676_v11 = vld [vmem:[#allocation5 + $0x8] sm:$0xff]   ;;  %v1684_v13 = vld [vmem:[#allocation5 + $0x10] sm:$0xff]   ;;  %vm934_vm5 = vcmask 261120  }
  0x38   :  { %1125 = vmatprep.mubr.msk.bf16.mxu0 %vm1564_vm0, %v1563_v1  ;;  %1145 = vmatprep.mubr.msk.bf16.mxu1 %vm1564_vm0, %v1563_v1  ;;  %v1657_v2 = vand.u32 127, %v99_v0  ;;  %v318_v3 = vshrl.u32 %v99_v0, 7  ;;  %v1680_v12 = vld [vmem:[#allocation7 + $0x8] sm:$0xff]   ;;  %v1688_v14 = vld [vmem:[#allocation7 + $0x10] sm:$0xff]   ;;  %v1692_v15 = vld [vmem:[#allocation5 + $0x18] sm:$0xff]  }
  0x39   :  { %1110 = vmatpush3.bf16.msra.mxu0 %v1669_v8  ;;  %1130 = vmatpush3.bf16.msra.mxu1 %v1673_v10  ;;  %v1696_v16 = vld [vmem:[#allocation7 + $0x18] sm:$0xff]   ;;  %v1700_v17 = vld [vmem:[#allocation5 + $0x20] sm:$0xff]   ;;  %v1708_v19 = vld [vmem:[#allocation5 + $0x28] sm:$0xff]  }
  0x3a   :  { %vm101_vm1 = vcmp.lt.s32.totalorder %v1657_v2, 32  ;;  %v319_v4 = vsub.s32 0, %v318_v3  ;;  %1111 = vmatprep.subr.bf16.mxu0 %v1563_v1  ;;  %1131 = vmatprep.subr.bf16.mxu1 %v1563_v1  ;;  %v1704_v18 = vld [vmem:[#allocation7 + $0x20] sm:$0xff]   ;;  %v1712_v20 = vld [vmem:[#allocation7 + $0x28] sm:$0xff]   ;;  %v1716_v21 = vld [vmem:[#allocation5 + $0x30] sm:$0xff]   ;;  %vm102_vm3 = vcmp.ge.s32.totalorder %v1657_v2, 96 }
  0x3b   :  { %vm1663_vm2 = vmpackc.low %vm101_vm1, %vm101_vm1  ;;  %v1720_v22 = vld [vmem:[#allocation7 + $0x30] sm:$0xff]   ;;  %v103_v23 = vld [vmem:[#allocation2] sm:$0xf] }
  0x3c   :  { %v316_v7 = vsel %vm1663_vm2, 65537, %v1565_v6  ;;  %v104_v24 = vld [vmem:[#allocation2 + $0x4] sm:$0xf]  ;;  %v106_v26 = vsel %vm1663_vm2, %v103_v23, 0  ;;  %v1778_v30 = vld [vmem:[%s2098_s3] ss:$0 sm:$0xff] }
  0x3d   :  { %v1671_v9 = vrot.slane %v316_v7, %v319_v4  ;;  %1112 = vmatpush3.bf16.msra.mxu0 %v1676_v11  ;;  %1132 = vmatpush3.bf16.msra.mxu1 %v1680_v12  ;;  %v1724_v25 = vld [vmem:[#allocation5 + $0x38] sm:$0xff]   ;;  %v107_v27 = vsel %vm1663_vm2, %v104_v24, 0  ;;  %s1566_s3 = smov [#allocation8]  }
  0x3e   :  { %1113 = vmatprep.subr.bf16.mxu0 %v1563_v1  ;;  %1133 = vmatprep.subr.bf16.mxu1 %v1563_v1  ;;  %v1732_v28 = vld [vmem:[#allocation7 + $0x38] sm:$0xff]   ;;  %v956_v29 = vcombine.low %v106_v26, %v107_v27 }
  0x3f   :  { %v1783_v31 = vld [vmem:[%s2099_s4] ss:$0 sm:$0xff]  ;;  %vm321_vm4 = vcmp.ne.s16.totalorder %v1671_v9, 0  ;;  %s942_s4 = sshll.u32 %s1566_s3, 4  ;;  %s943_s4 = int_to_ptr.vmem [resolvable:$true] %s942_s4 }
  0x40   :  { %s1530_s7 = scalar_lea.vmem %s943_s4, 256  ;;  %p1535_p11 = scmp.lt.s32.totalorder %s943_s4, %s943_s4 }
  0x41   :  { %1114 = vmatpush3.bf16.msra.mxu0 %v1684_v13  ;;  %1134 = vmatpush3.bf16.msra.mxu1 %v1688_v14  ;;  %p1531_p10 = scmp.ne.s32.totalorder %s943_s4, %s1530_s7  ;;  %p1536_p12 = scmp.lt.s32.totalorder %s1530_s7, %s1530_s7 }
  0x42   :  { %1115 = vmatprep.subr.bf16.mxu0 %v1563_v1  ;;  %1135 = vmatprep.subr.bf16.mxu1 %v1563_v1 }
  0x43   :  { %p1537_p13 = por %p1536_p12, %p1535_p11 }
  0x45   :  { %1116 = vmatpush3.bf16.msra.mxu0 %v1692_v15  ;;  %1136 = vmatpush3.bf16.msra.mxu1 %v1696_v16  ;;  %p1538_p0 = pnand %p1537_p13, %p1531_p10 }
  0x46   :  { %1117 = vmatprep.subr.bf16.mxu0 %v1563_v1  ;;  %1137 = vmatprep.subr.bf16.mxu1 %v1563_v1 }
  0x49   :  { %1118 = vmatpush3.bf16.msra.mxu0 %v1700_v17  ;;  %1138 = vmatpush3.bf16.msra.mxu1 %v1704_v18 }
  0x4a   :  { %1119 = vmatprep.subr.bf16.mxu0 %v1563_v1  ;;  %1139 = vmatprep.subr.bf16.mxu1 %v1563_v1 }
  0x4d   :  { %1120 = vmatpush3.bf16.msra.mxu0 %v1708_v19  ;;  %1140 = vmatpush3.bf16.msra.mxu1 %v1712_v20 }
  0x4e   :  { %1121 = vmatprep.subr.bf16.mxu0 %v1563_v1  ;;  %1141 = vmatprep.subr.bf16.mxu1 %v1563_v1 }
  0x51   :  { %1122 = vmatpush3.bf16.msra.mxu0 %v1716_v21  ;;  %1142 = vmatpush3.bf16.msra.mxu1 %v1720_v22 }
  0x52   :  { %1123 = vmatprep.subr.bf16.mxu0 %v1563_v1  ;;  %1143 = vmatprep.subr.bf16.mxu1 %v1563_v1 }
  0x55   :  { %1124 = vmatpush3.bf16.msra.mxu0 %v1724_v25  ;;  %1144 = vmatpush3.bf16.msra.mxu1 %v1732_v28 }
  0x56   :  { %1149 = vmatprep.subr.bf16.mxu0 %v1563_v1  ;;  %1169 = vmatprep.subr.bf16.mxu1 %v1563_v1 }
  0x58   :  { %1126 = vmatmul.mubr.bf16.vlgmr.msra.gmra.mrb[0].mxu0 %v956_v29  ;;  %1146 = vmatmul.mubr.bf16.vlgmr.msra.gmra.mrb[0].mxu1 %v1565_v6 }
  0x59   :  { %1150 = vmatpush3.bf16.msra.mxu0 %v1669_v8  ;;  %1170 = vmatpush3.bf16.msra.mxu1 %v1673_v10 }
  0x5a   :  { %1151 = vmatprep.subr.bf16.mxu0 %v1563_v1  ;;  %1171 = vmatprep.subr.bf16.mxu1 %v1563_v1 }
  0x5b   :  { %1165 = vmatprep.mubr.msk.bf16.mxu0 %vm1564_vm0, %v1563_v1  ;;  %1185 = vmatprep.mubr.msk.bf16.mxu1 %vm1564_vm0, %v1563_v1 }
  0x5d   :  { %1152 = vmatpush3.bf16.msra.mxu0 %v1676_v11  ;;  %1172 = vmatpush3.bf16.msra.mxu1 %v1680_v12 }
  0x5e   :  { %1153 = vmatprep.subr.bf16.mxu0 %v1563_v1  ;;  %1173 = vmatprep.subr.bf16.mxu1 %v1563_v1 }
  0x61   :  { %1154 = vmatpush3.bf16.msra.mxu0 %v1684_v13  ;;  %1174 = vmatpush3.bf16.msra.mxu1 %v1688_v14 }
  0x62   :  { %1155 = vmatprep.subr.bf16.mxu0 %v1563_v1  ;;  %1175 = vmatprep.subr.bf16.mxu1 %v1563_v1 }
  0x65   :  { %1156 = vmatpush3.bf16.msra.mxu0 %v1692_v15  ;;  %1176 = vmatpush3.bf16.msra.mxu1 %v1696_v16 }
  0x66   :  { %1157 = vmatprep.subr.bf16.mxu0 %v1563_v1  ;;  %1177 = vmatprep.subr.bf16.mxu1 %v1563_v1 }
  0x69   :  { %1158 = vmatpush3.bf16.msra.mxu0 %v1700_v17  ;;  %1178 = vmatpush3.bf16.msra.mxu1 %v1704_v18 }
  0x6a   :  { %1159 = vmatprep.subr.bf16.mxu0 %v1563_v1  ;;  %1179 = vmatprep.subr.bf16.mxu1 %v1563_v1 }
  0x6d   :  { %1160 = vmatpush3.bf16.msra.mxu0 %v1708_v19  ;;  %1180 = vmatpush3.bf16.msra.mxu1 %v1712_v20 }
  0x6e   :  { %1161 = vmatprep.subr.bf16.mxu0 %v1563_v1  ;;  %1181 = vmatprep.subr.bf16.mxu1 %v1563_v1 }
  0x71   :  { %1162 = vmatpush3.bf16.msra.mxu0 %v1716_v21  ;;  %1182 = vmatpush3.bf16.msra.mxu1 %v1720_v22 }
  0x72   :  { %1163 = vmatprep.subr.bf16.mxu0 %v1563_v1  ;;  %1183 = vmatprep.subr.bf16.mxu1 %v1563_v1 }
  0x75   :  { %1164 = vmatpush3.bf16.msra.mxu0 %v1724_v25  ;;  %1184 = vmatpush3.bf16.msra.mxu1 %v1732_v28 }
  0x76   :  { %1189 = vmatprep.subr.bf16.mxu0 %v1563_v1  ;;  %1209 = vmatprep.subr.bf16.mxu1 %v1563_v1 }
 0x12b   :  { %v202_v32 = vpop.f32.mrb[0].mxu0  ;;  %v297_v34 = vpop.f32.mrb[0].mxu1 }
 0x12c   :  { %v203_v33 = vadd.f32 %v1778_v30, %v202_v32  ;;  %v1127_v35 = vpop.f32.mrb[1].mxu0  ;;  %v298_v36 = vadd.f32 %v1783_v31, %v297_v34  ;;  %v1147_v37 = vpop.f32.mrb[1].mxu1 }
 0x12d   :  { %v205_v38 = vpop.f32.mrb[2].mxu0  ;;  %v300_v41 = vpop.f32.mrb[2].mxu1 }
 0x12e   :  { %v304_v39 = vmax.f32 %v203_v33, 0.0  ;;  %v206_v40 = vadd.f32 %v1778_v30, %v205_v38  ;;  %v1128_v42 = vpop.f32.mrb[3].mxu0  ;;  %1436 = vtanh.f32 %v298_v36  ;;  %v301_v43 = vadd.f32 %v1783_v31, %v300_v41  ;;  %v1148_v44 = vpop.f32.mrb[3].mxu1 }
 0x12f   :  { %v309_v47 = vmax.f32 %v298_v36, 0.0 }
 0x130   :  { %v305_v45 = vmax.f32 %v206_v40, 0.0  ;;  %1438 = vtanh.f32 %v301_v43  ;;  %v310_v50 = vmax.f32 %v301_v43, 0.0 }
 0x132   :  { %v306_v46 = vpack.c.bf16 %v305_v45, %v304_v39 }
 0x134   :  { %1166 = vmatmul.mubr.bf16.vlgmr.msra.gmra.mrb[4].mxu0 %v306_v46 }
 0x135   :  { %1190 = vmatpush3.bf16.msra.mxu0 %v1669_v8  ;;  %1205 = vmatprep.mubr.msk.bf16.mxu0 %vm1564_vm0, %v1563_v1 }
 0x136   :  { %1191 = vmatprep.subr.bf16.mxu0 %v1563_v1 }
 0x138   :  { %v1437_v48 = vpop.eup %1436 }
 0x139   :  { %1192 = vmatpush3.bf16.msra.mxu0 %v1676_v11  ;;  %v311_v49 = vsel %vm102_vm3, %v1437_v48, %v309_v47 }
 0x13a   :  { %1193 = vmatprep.subr.bf16.mxu0 %v1563_v1  ;;  %v1439_v51 = vpop.eup %1438  ;;  %v313_v53 = vsel %vm101_vm1, %v298_v36, %v311_v49 }
 0x13b   :  { %v312_v52 = vsel %vm102_vm3, %v1439_v51, %v310_v50 }
 0x13c   :  { %v314_v54 = vsel %vm101_vm1, %v301_v43, %v312_v52 }
 0x13d   :  { %1194 = vmatpush3.bf16.msra.mxu0 %v1684_v13  ;;  %v315_v55 = vpack.c.bf16 %v314_v54, %v313_v53 }
 0x13e   :  { %1195 = vmatprep.subr.bf16.mxu0 %v1563_v1 }
 0x13f   :  { %v322_v56 = vsel %vm321_vm4, %v306_v46, %v315_v55 }
 0x140   :  { %1186 = vmatmul.mubr.bf16.vlgmr.msra.gmra.mrb[4].mxu1 %v322_v56 }
 0x141   :  { %1196 = vmatpush3.bf16.msra.mxu0 %v1692_v15  ;;  %1210 = vmatpush3.bf16.msra.mxu1 %v1673_v10 }
 0x142   :  { %1197 = vmatprep.subr.bf16.mxu0 %v1563_v1  ;;  %1211 = vmatprep.subr.bf16.mxu1 %v1563_v1 }
 0x143   :  { %1225 = vmatprep.mubr.msk.bf16.mxu1 %vm1564_vm0, %v1563_v1 }
 0x145   :  { %1198 = vmatpush3.bf16.msra.mxu0 %v1700_v17  ;;  %1212 = vmatpush3.bf16.msra.mxu1 %v1680_v12 }
 0x146   :  { %1199 = vmatprep.subr.bf16.mxu0 %v1563_v1  ;;  %1213 = vmatprep.subr.bf16.mxu1 %v1563_v1 }
 0x149   :  { %1200 = vmatpush3.bf16.msra.mxu0 %v1708_v19  ;;  %1214 = vmatpush3.bf16.msra.mxu1 %v1688_v14 }
 0x14a   :  { %1201 = vmatprep.subr.bf16.mxu0 %v1563_v1  ;;  %1215 = vmatprep.subr.bf16.mxu1 %v1563_v1 }
 0x14d   :  { %1202 = vmatpush3.bf16.msra.mxu0 %v1716_v21  ;;  %1216 = vmatpush3.bf16.msra.mxu1 %v1696_v16 }
 0x14e   :  { %1203 = vmatprep.subr.bf16.mxu0 %v1563_v1  ;;  %1217 = vmatprep.subr.bf16.mxu1 %v1563_v1 }
 0x151   :  { %1204 = vmatpush3.bf16.msra.mxu0 %v1724_v25  ;;  %1218 = vmatpush3.bf16.msra.mxu1 %v1704_v18 }
 0x152   :  { %1229 = vmatprep.subr.bf16.mxu0 %v1563_v1  ;;  %1219 = vmatprep.subr.bf16.mxu1 %v1563_v1 }
 0x155   :  { %1220 = vmatpush3.bf16.msra.mxu1 %v1712_v20 }
 0x156   :  { %1221 = vmatprep.subr.bf16.mxu1 %v1563_v1 }
 0x159   :  { %1222 = vmatpush3.bf16.msra.mxu1 %v1720_v22 }
 0x15a   :  { %1223 = vmatprep.subr.bf16.mxu1 %v1563_v1 }
 0x15d   :  { %1224 = vmatpush3.bf16.msra.mxu1 %v1732_v28 }
 0x15e   :  { %1249 = vmatprep.subr.bf16.mxu1 %v1563_v1 }
 0x207   :  { %v357_v57 = vpop.f32.mrb[4].mxu0 }
 0x208   :  { %v358_v58 = vadd.f32 %v1778_v30, %v357_v57  ;;  %v1167_v59 = vpop.f32.mrb[5].mxu0 }
 0x209   :  { %v360_v60 = vpop.f32.mrb[6].mxu0 }
 0x20a   :  { %v405_v61 = vmax.f32 %v358_v58, 0.0  ;;  %v361_v62 = vadd.f32 %v1778_v30, %v360_v60  ;;  %v1168_v63 = vpop.f32.mrb[7].mxu0 }
 0x20c   :  { %v406_v0 = vmax.f32 %v361_v62, 0.0 }
 0x20e   :  { %v407_v3 = vpack.c.bf16 %v406_v0, %v405_v61 }
 0x210   :  { %1206 = vmatmul.mubr.bf16.vlgmr.msra.gmra.mrb[8].mxu0 %v407_v3 }
 0x211   :  { %1230 = vmatpush3.bf16.msra.mxu0 %v1669_v8  ;;  %1245 = vmatprep.mubr.msk.bf16.mxu0 %vm1564_vm0, %v1563_v1 }
 0x212   :  { %1231 = vmatprep.subr.bf16.mxu0 %v1563_v1 }
 0x213   :  { %v398_v4 = vpop.f32.mrb[4].mxu1 }
 0x214   :  { %v399_v5 = vadd.f32 %v1783_v31, %v398_v4  ;;  %v1187_v6 = vpop.f32.mrb[5].mxu1 }
 0x215   :  { %1232 = vmatpush3.bf16.msra.mxu0 %v1676_v11  ;;  %v401_v7 = vpop.f32.mrb[6].mxu1 }
 0x216   :  { %1233 = vmatprep.subr.bf16.mxu0 %v1563_v1  ;;  %1440 = vtanh.f32 %v399_v5  ;;  %v402_v23 = vadd.f32 %v1783_v31, %v401_v7  ;;  %v1188_v24 = vpop.f32.mrb[7].mxu1  ;;  %v410_v26 = vmax.f32 %v399_v5, 0.0 }
 0x218   :  { %1442 = vtanh.f32 %v402_v23  ;;  %v411_v32 = vmax.f32 %v402_v23, 0.0 }
 0x219   :  { %1234 = vmatpush3.bf16.msra.mxu0 %v1684_v13 }
 0x21a   :  { %1235 = vmatprep.subr.bf16.mxu0 %v1563_v1 }
 0x21d   :  { %1236 = vmatpush3.bf16.msra.mxu0 %v1692_v15 }
 0x21e   :  { %1237 = vmatprep.subr.bf16.mxu0 %v1563_v1 }
 0x220   :  { %v1441_v27 = vpop.eup %1440 }
 0x221   :  { %1238 = vmatpush3.bf16.msra.mxu0 %v1700_v17  ;;  %v412_v29 = vsel %vm102_vm3, %v1441_v27, %v410_v26 }
 0x222   :  { %1239 = vmatprep.subr.bf16.mxu0 %v1563_v1  ;;  %v1443_v33 = vpop.eup %1442  ;;  %v414_v35 = vsel %vm101_vm1, %v399_v5, %v412_v29 }
 0x223   :  { %v413_v34 = vsel %vm102_vm3, %v1443_v33, %v411_v32 }
 0x224   :  { %v415_v36 = vsel %vm101_vm1, %v402_v23, %v413_v34 }
 0x225   :  { %1240 = vmatpush3.bf16.msra.mxu0 %v1708_v19  ;;  %v416_v37 = vpack.c.bf16 %v415_v36, %v414_v35 }
 0x226   :  { %1241 = vmatprep.subr.bf16.mxu0 %v1563_v1 }
 0x227   :  { %v417_v38 = vsel %vm321_vm4, %v407_v3, %v416_v37 }
 0x228   :  { %1226 = vmatmul.mubr.bf16.vlgmr.msra.gmra.mrb[8].mxu1 %v417_v38 }
 0x229   :  { %1242 = vmatpush3.bf16.msra.mxu0 %v1716_v21  ;;  %1250 = vmatpush3.bf16.msra.mxu1 %v1673_v10 }
 0x22a   :  { %1243 = vmatprep.subr.bf16.mxu0 %v1563_v1  ;;  %1251 = vmatprep.subr.bf16.mxu1 %v1563_v1 }
 0x22b   :  { %1265 = vmatprep.mubr.msk.bf16.mxu1 %vm1564_vm0, %v1563_v1 }
 0x22d   :  { %1244 = vmatpush3.bf16.msra.mxu0 %v1724_v25  ;;  %1252 = vmatpush3.bf16.msra.mxu1 %v1680_v12 }
 0x22e   :  { %1269 = vmatprep.subr.bf16.mxu0 %v1563_v1  ;;  %1253 = vmatprep.subr.bf16.mxu1 %v1563_v1 }
 0x231   :  { %1254 = vmatpush3.bf16.msra.mxu1 %v1688_v14 }
 0x232   :  { %1255 = vmatprep.subr.bf16.mxu1 %v1563_v1 }
 0x235   :  { %1256 = vmatpush3.bf16.msra.mxu1 %v1696_v16 }
 0x236   :  { %1257 = vmatprep.subr.bf16.mxu1 %v1563_v1 }
 0x239   :  { %1258 = vmatpush3.bf16.msra.mxu1 %v1704_v18 }
 0x23a   :  { %1259 = vmatprep.subr.bf16.mxu1 %v1563_v1 }
 0x23d   :  { %1260 = vmatpush3.bf16.msra.mxu1 %v1712_v20 }
 0x23e   :  { %1261 = vmatprep.subr.bf16.mxu1 %v1563_v1 }
 0x241   :  { %1262 = vmatpush3.bf16.msra.mxu1 %v1720_v22 }
 0x242   :  { %1263 = vmatprep.subr.bf16.mxu1 %v1563_v1 }
 0x245   :  { %1264 = vmatpush3.bf16.msra.mxu1 %v1732_v28 }
 0x246   :  { %1289 = vmatprep.subr.bf16.mxu1 %v1563_v1 }
 0x2e3   :  { %v452_v39 = vpop.f32.mrb[8].mxu0 }
 0x2e4   :  { %v453_v40 = vadd.f32 %v1778_v30, %v452_v39  ;;  %v1207_v41 = vpop.f32.mrb[9].mxu0 }
 0x2e5   :  { %v455_v42 = vpop.f32.mrb[10].mxu0 }
 0x2e6   :  { %v500_v43 = vmax.f32 %v453_v40, 0.0  ;;  %v456_v44 = vadd.f32 %v1778_v30, %v455_v42  ;;  %v1208_v45 = vpop.f32.mrb[11].mxu0 }
 0x2e8   :  { %v501_v46 = vmax.f32 %v456_v44, 0.0 }
 0x2ea   :  { %v502_v47 = vpack.c.bf16 %v501_v46, %v500_v43 }
 0x2ec   :  { %1246 = vmatmul.mubr.bf16.vlgmr.msra.gmra.mrb[12].mxu0 %v502_v47 }
 0x2ed   :  { %1270 = vmatpush3.bf16.msra.mxu0 %v1669_v8  ;;  %1285 = vmatprep.mubr.msk.bf16.mxu0 %vm1564_vm0, %v1563_v1 }
 0x2ee   :  { %1271 = vmatprep.subr.bf16.mxu0 %v1563_v1 }
 0x2f1   :  { %1272 = vmatpush3.bf16.msra.mxu0 %v1676_v11 }
 0x2f2   :  { %1273 = vmatprep.subr.bf16.mxu0 %v1563_v1 }
 0x2f5   :  { %1274 = vmatpush3.bf16.msra.mxu0 %v1684_v13 }
 0x2f6   :  { %1275 = vmatprep.subr.bf16.mxu0 %v1563_v1 }
 0x2f9   :  { %1276 = vmatpush3.bf16.msra.mxu0 %v1692_v15 }
 0x2fa   :  { %1277 = vmatprep.subr.bf16.mxu0 %v1563_v1 }
 0x2fb   :  { %v493_v48 = vpop.f32.mrb[8].mxu1 }
 0x2fc   :  { %v494_v49 = vadd.f32 %v1783_v31, %v493_v48  ;;  %v1227_v50 = vpop.f32.mrb[9].mxu1 }
 0x2fd   :  { %1278 = vmatpush3.bf16.msra.mxu0 %v1700_v17  ;;  %v496_v51 = vpop.f32.mrb[10].mxu1 }
 0x2fe   :  { %1279 = vmatprep.subr.bf16.mxu0 %v1563_v1  ;;  %1444 = vtanh.f32 %v494_v49  ;;  %v497_v52 = vadd.f32 %v1783_v31, %v496_v51  ;;  %v1228_v53 = vpop.f32.mrb[11].mxu1  ;;  %v505_v54 = vmax.f32 %v494_v49, 0.0 }
 0x300   :  { %1446 = vtanh.f32 %v497_v52  ;;  %v506_v57 = vmax.f32 %v497_v52, 0.0 }
 0x301   :  { %1280 = vmatpush3.bf16.msra.mxu0 %v1708_v19 }
 0x302   :  { %1281 = vmatprep.subr.bf16.mxu0 %v1563_v1 }
 0x305   :  { %1282 = vmatpush3.bf16.msra.mxu0 %v1716_v21 }
 0x306   :  { %1283 = vmatprep.subr.bf16.mxu0 %v1563_v1 }
 0x308   :  { %v1445_v55 = vpop.eup %1444 }
 0x309   :  { %1284 = vmatpush3.bf16.msra.mxu0 %v1724_v25  ;;  %v507_v56 = vsel %vm102_vm3, %v1445_v55, %v505_v54 }
 0x30a   :  { %1309 = vmatprep.subr.bf16.mxu0 %v1563_v1  ;;  %v1447_v58 = vpop.eup %1446  ;;  %v509_v60 = vsel %vm101_vm1, %v494_v49, %v507_v56 }
 0x30b   :  { %v508_v59 = vsel %vm102_vm3, %v1447_v58, %v506_v57 }
 0x30c   :  { %v510_v61 = vsel %vm101_vm1, %v497_v52, %v508_v59 }
 0x30d   :  { %v511_v62 = vpack.c.bf16 %v510_v61, %v509_v60 }
 0x30f   :  { %v512_v63 = vsel %vm321_vm4, %v502_v47, %v511_v62 }
 0x310   :  { %1266 = vmatmul.mubr.bf16.vlgmr.msra.gmra.mrb[12].mxu1 %v512_v63 }
 0x311   :  { %1290 = vmatpush3.bf16.msra.mxu1 %v1673_v10  ;;  %1305 = vmatprep.mubr.msk.bf16.mxu1 %vm1564_vm0, %v1563_v1 }
 0x312   :  { %1291 = vmatprep.subr.bf16.mxu1 %v1563_v1 }
 0x315   :  { %1292 = vmatpush3.bf16.msra.mxu1 %v1680_v12 }
 0x316   :  { %1293 = vmatprep.subr.bf16.mxu1 %v1563_v1 }
 0x319   :  { %1294 = vmatpush3.bf16.msra.mxu1 %v1688_v14 }
 0x31a   :  { %1295 = vmatprep.subr.bf16.mxu1 %v1563_v1 }
 0x31d   :  { %1296 = vmatpush3.bf16.msra.mxu1 %v1696_v16 }
 0x31e   :  { %1297 = vmatprep.subr.bf16.mxu1 %v1563_v1 }
 0x321   :  { %1298 = vmatpush3.bf16.msra.mxu1 %v1704_v18 }
 0x322   :  { %1299 = vmatprep.subr.bf16.mxu1 %v1563_v1 }
 0x325   :  { %1300 = vmatpush3.bf16.msra.mxu1 %v1712_v20 }
 0x326   :  { %1301 = vmatprep.subr.bf16.mxu1 %v1563_v1 }
 0x329   :  { %1302 = vmatpush3.bf16.msra.mxu1 %v1720_v22 }
 0x32a   :  { %1303 = vmatprep.subr.bf16.mxu1 %v1563_v1 }
 0x32d   :  { %1304 = vmatpush3.bf16.msra.mxu1 %v1732_v28 }
 0x32e   :  { %1329 = vmatprep.subr.bf16.mxu1 %v1563_v1 }
 0x3bf   :  { %v547_v0 = vpop.f32.mrb[12].mxu0 }
 0x3c0   :  { %v548_v3 = vadd.f32 %v1778_v30, %v547_v0  ;;  %v1247_v4 = vpop.f32.mrb[13].mxu0 }
 0x3c1   :  { %v550_v5 = vpop.f32.mrb[14].mxu0 }
 0x3c2   :  { %v595_v6 = vmax.f32 %v548_v3, 0.0  ;;  %v551_v7 = vadd.f32 %v1778_v30, %v550_v5  ;;  %v1248_v23 = vpop.f32.mrb[15].mxu0 }
 0x3c4   :  { %v596_v24 = vmax.f32 %v551_v7, 0.0 }
 0x3c6   :  { %v597_v26 = vpack.c.bf16 %v596_v24, %v595_v6 }
 0x3c8   :  { %1286 = vmatmul.mubr.bf16.vlgmr.msra.gmra.mrb[16].mxu0 %v597_v26 }
 0x3c9   :  { %1310 = vmatpush3.bf16.msra.mxu0 %v1669_v8  ;;  %1325 = vmatprep.mubr.msk.bf16.mxu0 %vm1564_vm0, %v1563_v1 }
 0x3ca   :  { %1311 = vmatprep.subr.bf16.mxu0 %v1563_v1 }
 0x3cd   :  { %1312 = vmatpush3.bf16.msra.mxu0 %v1676_v11 }
 0x3ce   :  { %1313 = vmatprep.subr.bf16.mxu0 %v1563_v1 }
 0x3d1   :  { %1314 = vmatpush3.bf16.msra.mxu0 %v1684_v13 }
 0x3d2   :  { %1315 = vmatprep.subr.bf16.mxu0 %v1563_v1 }
 0x3d5   :  { %1316 = vmatpush3.bf16.msra.mxu0 %v1692_v15 }
 0x3d6   :  { %1317 = vmatprep.subr.bf16.mxu0 %v1563_v1 }
 0x3d9   :  { %1318 = vmatpush3.bf16.msra.mxu0 %v1700_v17 }
 0x3da   :  { %1319 = vmatprep.subr.bf16.mxu0 %v1563_v1 }
 0x3dd   :  { %1320 = vmatpush3.bf16.msra.mxu0 %v1708_v19 }
 0x3de   :  { %1321 = vmatprep.subr.bf16.mxu0 %v1563_v1 }
 0x3e1   :  { %1322 = vmatpush3.bf16.msra.mxu0 %v1716_v21 }
 0x3e2   :  { %1323 = vmatprep.subr.bf16.mxu0 %v1563_v1 }
 0x3e3   :  { %v588_v27 = vpop.f32.mrb[12].mxu1 }
 0x3e4   :  { %v589_v29 = vadd.f32 %v1783_v31, %v588_v27  ;;  %v1267_v32 = vpop.f32.mrb[13].mxu1 }
 0x3e5   :  { %1324 = vmatpush3.bf16.msra.mxu0 %v1724_v25  ;;  %v591_v33 = vpop.f32.mrb[14].mxu1 }
 0x3e6   :  { %1349 = vmatprep.subr.bf16.mxu0 %v1563_v1  ;;  %1448 = vtanh.f32 %v589_v29  ;;  %v592_v34 = vadd.f32 %v1783_v31, %v591_v33  ;;  %v1268_v35 = vpop.f32.mrb[15].mxu1  ;;  %v600_v36 = vmax.f32 %v589_v29, 0.0 }
 0x3e8   :  { %1450 = vtanh.f32 %v592_v34  ;;  %v601_v39 = vmax.f32 %v592_v34, 0.0 }
 0x3f0   :  { %v1449_v37 = vpop.eup %1448 }
 0x3f1   :  { %v602_v38 = vsel %vm102_vm3, %v1449_v37, %v600_v36 }
 0x3f2   :  { %v1451_v40 = vpop.eup %1450  ;;  %v604_v42 = vsel %vm101_vm1, %v589_v29, %v602_v38 }
 0x3f3   :  { %v603_v41 = vsel %vm102_vm3, %v1451_v40, %v601_v39 }
 0x3f4   :  { %v605_v43 = vsel %vm101_vm1, %v592_v34, %v603_v41 }
 0x3f5   :  { %v606_v44 = vpack.c.bf16 %v605_v43, %v604_v42 }
 0x3f7   :  { %v607_v45 = vsel %vm321_vm4, %v597_v26, %v606_v44 }
 0x3f8   :  { %1306 = vmatmul.mubr.bf16.vlgmr.msra.gmra.mrb[16].mxu1 %v607_v45 }
 0x3f9   :  { %1330 = vmatpush3.bf16.msra.mxu1 %v1673_v10  ;;  %1345 = vmatprep.mubr.msk.bf16.mxu1 %vm1564_vm0, %v1563_v1 }
 0x3fa   :  { %1331 = vmatprep.subr.bf16.mxu1 %v1563_v1 }
 0x3fd   :  { %1332 = vmatpush3.bf16.msra.mxu1 %v1680_v12 }
 0x3fe   :  { %1333 = vmatprep.subr.bf16.mxu1 %v1563_v1 }
 0x401   :  { %1334 = vmatpush3.bf16.msra.mxu1 %v1688_v14 }
 0x402   :  { %1335 = vmatprep.subr.bf16.mxu1 %v1563_v1 }
 0x405   :  { %1336 = vmatpush3.bf16.msra.mxu1 %v1696_v16 }
 0x406   :  { %1337 = vmatprep.subr.bf16.mxu1 %v1563_v1 }
 0x409   :  { %1338 = vmatpush3.bf16.msra.mxu1 %v1704_v18 }
 0x40a   :  { %1339 = vmatprep.subr.bf16.mxu1 %v1563_v1 }
 0x40d   :  { %1340 = vmatpush3.bf16.msra.mxu1 %v1712_v20 }
 0x40e   :  { %1341 = vmatprep.subr.bf16.mxu1 %v1563_v1 }
 0x411   :  { %1342 = vmatpush3.bf16.msra.mxu1 %v1720_v22 }
 0x412   :  { %1343 = vmatprep.subr.bf16.mxu1 %v1563_v1 }
 0x415   :  { %1344 = vmatpush3.bf16.msra.mxu1 %v1732_v28 }
 0x416   :  { %1369 = vmatprep.subr.bf16.mxu1 %v1563_v1 }
 0x49b   :  { %v642_v46 = vpop.f32.mrb[16].mxu0 }
 0x49c   :  { %v643_v47 = vadd.f32 %v1778_v30, %v642_v46  ;;  %v1287_v48 = vpop.f32.mrb[17].mxu0 }
 0x49d   :  { %v645_v49 = vpop.f32.mrb[18].mxu0 }
 0x49e   :  { %v690_v50 = vmax.f32 %v643_v47, 0.0  ;;  %v646_v51 = vadd.f32 %v1778_v30, %v645_v49  ;;  %v1288_v52 = vpop.f32.mrb[19].mxu0 }
 0x4a0   :  { %v691_v53 = vmax.f32 %v646_v51, 0.0 }
 0x4a2   :  { %v692_v54 = vpack.c.bf16 %v691_v53, %v690_v50 }
 0x4a4   :  { %1326 = vmatmul.mubr.bf16.vlgmr.msra.gmra.mrb[20].mxu0 %v692_v54 }
 0x4a5   :  { %1350 = vmatpush3.bf16.msra.mxu0 %v1669_v8  ;;  %1365 = vmatprep.mubr.msk.bf16.mxu0 %vm1564_vm0, %v1563_v1 }
 0x4a6   :  { %1351 = vmatprep.subr.bf16.mxu0 %v1563_v1 }
 0x4a9   :  { %1352 = vmatpush3.bf16.msra.mxu0 %v1676_v11 }
 0x4aa   :  { %1353 = vmatprep.subr.bf16.mxu0 %v1563_v1 }
 0x4ad   :  { %1354 = vmatpush3.bf16.msra.mxu0 %v1684_v13 }
 0x4ae   :  { %1355 = vmatprep.subr.bf16.mxu0 %v1563_v1 }
 0x4b1   :  { %1356 = vmatpush3.bf16.msra.mxu0 %v1692_v15 }
 0x4b2   :  { %1357 = vmatprep.subr.bf16.mxu0 %v1563_v1 }
 0x4b5   :  { %1358 = vmatpush3.bf16.msra.mxu0 %v1700_v17 }
 0x4b6   :  { %1359 = vmatprep.subr.bf16.mxu0 %v1563_v1 }
 0x4b9   :  { %1360 = vmatpush3.bf16.msra.mxu0 %v1708_v19 }
 0x4ba   :  { %1361 = vmatprep.subr.bf16.mxu0 %v1563_v1 }
 0x4bd   :  { %1362 = vmatpush3.bf16.msra.mxu0 %v1716_v21 }
 0x4be   :  { %1363 = vmatprep.subr.bf16.mxu0 %v1563_v1 }
 0x4c1   :  { %1364 = vmatpush3.bf16.msra.mxu0 %v1724_v25 }
 0x4c2   :  { %1389 = vmatprep.subr.bf16.mxu0 %v1563_v1 }
 0x4cb   :  { %v683_v8 = vpop.f32.mrb[16].mxu1 }
 0x4cc   :  { %v684_v11 = vadd.f32 %v1783_v31, %v683_v8  ;;  %v1307_v13 = vpop.f32.mrb[17].mxu1 }
 0x4cd   :  { %v686_v15 = vpop.f32.mrb[18].mxu1 }
 0x4ce   :  { %1452 = vtanh.f32 %v684_v11  ;;  %v687_v17 = vadd.f32 %v1783_v31, %v686_v15  ;;  %v1308_v55 = vpop.f32.mrb[19].mxu1  ;;  %v695_v19 = vmax.f32 %v684_v11, 0.0 }
 0x4d0   :  { %1454 = vtanh.f32 %v687_v17  ;;  %v696_v57 = vmax.f32 %v687_v17, 0.0 }
 0x4d8   :  { %v1453_v56 = vpop.eup %1452 }
 0x4d9   :  { %v697_v21 = vsel %vm102_vm3, %v1453_v56, %v695_v19 }
 0x4da   :  { %v1455_v58 = vpop.eup %1454  ;;  %v699_v59 = vsel %vm101_vm1, %v684_v11, %v697_v21 }
 0x4db   :  { %v698_v25 = vsel %vm102_vm3, %v1455_v58, %v696_v57 }
 0x4dc   :  { %v700_v60 = vsel %vm101_vm1, %v687_v17, %v698_v25 }
 0x4dd   :  { %v701_v61 = vpack.c.bf16 %v700_v60, %v699_v59 }
 0x4df   :  { %v702_v62 = vsel %vm321_vm4, %v692_v54, %v701_v61 }
 0x4e0   :  { %1346 = vmatmul.mubr.bf16.vlgmr.msra.gmra.mrb[20].mxu1 %v702_v62 }
 0x4e1   :  { %1370 = vmatpush3.bf16.msra.mxu1 %v1673_v10  ;;  %1385 = vmatprep.mubr.msk.bf16.mxu1 %vm1564_vm0, %v1563_v1 }
 0x4e2   :  { %1371 = vmatprep.subr.bf16.mxu1 %v1563_v1 }
 0x4e5   :  { %1372 = vmatpush3.bf16.msra.mxu1 %v1680_v12 }
 0x4e6   :  { %1373 = vmatprep.subr.bf16.mxu1 %v1563_v1 }
 0x4e9   :  { %1374 = vmatpush3.bf16.msra.mxu1 %v1688_v14 }
 0x4ea   :  { %1375 = vmatprep.subr.bf16.mxu1 %v1563_v1 }
 0x4ed   :  { %1376 = vmatpush3.bf16.msra.mxu1 %v1696_v16 }
 0x4ee   :  { %1377 = vmatprep.subr.bf16.mxu1 %v1563_v1 }
 0x4f1   :  { %1378 = vmatpush3.bf16.msra.mxu1 %v1704_v18 }
 0x4f2   :  { %1379 = vmatprep.subr.bf16.mxu1 %v1563_v1 }
 0x4f5   :  { %1380 = vmatpush3.bf16.msra.mxu1 %v1712_v20 }
 0x4f6   :  { %1381 = vmatprep.subr.bf16.mxu1 %v1563_v1 }
 0x4f9   :  { %1382 = vmatpush3.bf16.msra.mxu1 %v1720_v22 }
 0x4fa   :  { %1383 = vmatprep.subr.bf16.mxu1 %v1563_v1 }
 0x4fd   :  { %1384 = vmatpush3.bf16.msra.mxu1 %v1732_v28 }
 0x577   :  { %v737_v63 = vpop.f32.mrb[20].mxu0 }
 0x578   :  { %v738_v0 = vadd.f32 %v1778_v30, %v737_v63  ;;  %v1327_v3 = vpop.f32.mrb[21].mxu0 }
 0x579   :  { %v740_v4 = vpop.f32.mrb[22].mxu0 }
 0x57a   :  { %v785_v5 = vmax.f32 %v738_v0, 0.0  ;;  %v741_v6 = vadd.f32 %v1778_v30, %v740_v4  ;;  %v1328_v7 = vpop.f32.mrb[23].mxu0 }
 0x57c   :  { %v786_v23 = vmax.f32 %v741_v6, 0.0 }
 0x57e   :  { %v787_v24 = vpack.c.bf16 %v786_v23, %v785_v5 }
 0x580   :  { %1366 = vmatmul.mubr.bf16.vlgmr.msra.gmra.mrb[24].mxu0 %v787_v24 }
 0x581   :  { %1390 = vmatpush3.bf16.msra.mxu0 %v1673_v10  ;;  %1405 = vmatprep.mubr.msk.bf16.mxu0 %vm1564_vm0, %v1563_v1 }
 0x582   :  { %1391 = vmatprep.subr.bf16.mxu0 %v1563_v1 }
 0x585   :  { %1392 = vmatpush3.bf16.msra.mxu0 %v1680_v12 }
 0x586   :  { %1393 = vmatprep.subr.bf16.mxu0 %v1563_v1 }
 0x589   :  { %1394 = vmatpush3.bf16.msra.mxu0 %v1688_v14 }
 0x58a   :  { %1395 = vmatprep.subr.bf16.mxu0 %v1563_v1 }
 0x58d   :  { %1396 = vmatpush3.bf16.msra.mxu0 %v1696_v16 }
 0x58e   :  { %1397 = vmatprep.subr.bf16.mxu0 %v1563_v1 }
 0x591   :  { %1398 = vmatpush3.bf16.msra.mxu0 %v1704_v18 }
 0x592   :  { %1399 = vmatprep.subr.bf16.mxu0 %v1563_v1 }
 0x595   :  { %1400 = vmatpush3.bf16.msra.mxu0 %v1712_v20 }
 0x596   :  { %1401 = vmatprep.subr.bf16.mxu0 %v1563_v1 }
 0x599   :  { %1402 = vmatpush3.bf16.msra.mxu0 %v1720_v22 }
 0x59a   :  { %1403 = vmatprep.subr.bf16.mxu0 %v1563_v1 }
 0x59d   :  { %1404 = vmatpush3.bf16.msra.mxu0 %v1732_v28 }
 0x5b3   :  { %v778_v10 = vpop.f32.mrb[20].mxu1 }
 0x5b4   :  { %v779_v12 = vadd.f32 %v1783_v31, %v778_v10  ;;  %v1347_v14 = vpop.f32.mrb[21].mxu1 }
 0x5b5   :  { %v781_v16 = vpop.f32.mrb[22].mxu1 }
 0x5b6   :  { %1456 = vtanh.f32 %v779_v12  ;;  %v782_v18 = vadd.f32 %v1783_v31, %v781_v16  ;;  %v1348_v26 = vpop.f32.mrb[23].mxu1  ;;  %v790_v27 = vmax.f32 %v779_v12, 0.0 }
 0x5b8   :  { %1458 = vtanh.f32 %v782_v18  ;;  %v791_v22 = vmax.f32 %v782_v18, 0.0 }
 0x5c0   :  { %v1457_v20 = vpop.eup %1456 }
 0x5c1   :  { %v792_v29 = vsel %vm102_vm3, %v1457_v20, %v790_v27 }
 0x5c2   :  { %v1459_v32 = vpop.eup %1458  ;;  %v794_v28 = vsel %vm101_vm1, %v779_v12, %v792_v29 }
 0x5c3   :  { %v793_v1 = vsel %vm102_vm3, %v1459_v32, %v791_v22 }
 0x5c4   :  { %v795_v33 = vsel %vm101_vm1, %v782_v18, %v793_v1 }
 0x5c5   :  { %v796_v34 = vpack.c.bf16 %v795_v33, %v794_v28 }
 0x5c7   :  { %v797_v35 = vsel %vm321_vm4, %v787_v24, %v796_v34 }
 0x5c8   :  { %1386 = vmatmul.mubr.bf16.vlgmr.msra.gmra.mrb[24].mxu1 %v797_v35 }
 0x653   :  { %v832_v36 = vpop.f32.mrb[24].mxu0 }
 0x654   :  { %v833_v37 = vadd.f32 %v1778_v30, %v832_v36  ;;  %v1367_v38 = vpop.f32.mrb[25].mxu0 }
 0x655   :  { %v835_v39 = vpop.f32.mrb[26].mxu0 }
 0x656   :  { %v836_v40 = vadd.f32 %v1778_v30, %v835_v39  ;;  %v1368_v41 = vpop.f32.mrb[27].mxu0  ;;  %v880_v42 = vmax.f32 %v833_v37, 0.0 }
 0x658   :  { %v881_v43 = vmax.f32 %v836_v40, 0.0 }
 0x65a   :  { %v882_v44 = vpack.c.bf16 %v881_v43, %v880_v42 }
 0x69b   :  { %v873_v45 = vpop.f32.mrb[24].mxu1 }
 0x69c   :  { %v874_v46 = vadd.f32 %v1783_v31, %v873_v45  ;;  %v1387_v47 = vpop.f32.mrb[25].mxu1 }
 0x69d   :  { %v876_v48 = vpop.f32.mrb[26].mxu1 }
 0x69e   :  { %1460 = vtanh.f32 %v874_v46  ;;  %v877_v49 = vadd.f32 %v1783_v31, %v876_v48  ;;  %v1388_v50 = vpop.f32.mrb[27].mxu1  ;;  %v885_v51 = vmax.f32 %v874_v46, 0.0 }
 0x6a0   :  { %1462 = vtanh.f32 %v877_v49  ;;  %v886_v30 = vmax.f32 %v877_v49, 0.0 }
 0x6a8   :  { %v1461_v52 = vpop.eup %1460 }
 0x6a9   :  { %v887_v53 = vsel %vm102_vm3, %v1461_v52, %v885_v51 }
 0x6aa   :  { %v1463_v54 = vpop.eup %1462  ;;  %v889_v11 = vsel %vm101_vm1, %v874_v46, %v887_v53 }
 0x6ab   :  { %v888_v8 = vsel %vm102_vm3, %v1463_v54, %v886_v30 }
 0x6ac   :  { %v890_v13 = vsel %vm101_vm1, %v877_v49, %v888_v8 }
 0x6ad   :  { %v891_v15 = vpack.c.bf16 %v890_v13, %v889_v11 }
 0x6af   :  { %v892_v17 = vsel %vm321_vm4, %v882_v44, %v891_v15 }
 0x6b0   :  { %1406 = vmatmul.mubr.bf16.vlgmr.msra.gmra.mrb[28].mxu0 %v892_v17 }
 0x783   :  { %v927_v55 = vpop.f32.mrb[28].mxu0 }
 0x784   :  { %v928_v19 = vadd.f32 %v1783_v31, %v927_v55  ;;  %v1407_v56 = vpop.f32.mrb[29].mxu0 }
 0x785   :  { %v930_v21 = vpop.f32.mrb[30].mxu0 }
 0x786   :  { %935 = vst.msk [vmem:[#allocation8] sm:$0xff] %vm934_vm5, %v928_v19  ;;  %v931_v57 = vadd.f32 %v1783_v31, %v930_v21  ;;  %v1408_v58 = vpop.f32.mrb[31].mxu0 }
 0x788   :  { %936 = vst.msk [vmem:[#allocation8 + $0x8] sm:$0xff] %vm934_vm5, %v931_v57 }
 0x789   :  { %1541 = shalt.err (!%p1538_p0)
}
 0x78a   :  { %s1542_s10 = scalar_lea.hbm %s2100_s5, 256 }
 0x78b   :  { %p1543_p1 = scmp.ne.s32.totalorder %s2100_s5, %s1542_s10  ;;  %p1546_p2 = scmp.lt.u32.totalorder %s1542_s10, %s2100_s5 }
 0x78d   :  { %p1548_p3 = pnand %p1546_p2, %p1543_p1 }
 0x78f   :  { %1551 = shalt.err (!%p1548_p3)
}
 0x790   :  { %s1567_s15 = smov 128   ;;  %s1568_s16 = smov 8  }
 0x791   :  { %948 = dma.vmem_to_hbm [thread:$0]  %s943_s4, 256, %s2100_s5, [#allocation4], %s1567_s15, %s1567_s15, %s1568_s16  }
 0x792   :  { %1556 = dma.done.wait [#allocation4], 256  }
 0x793   :  { %1557 = vsyncadd [#allocation4], 4294967040 }
 0x794   :  { %952 = vsyncpa [#allocation3], 1 }
 0x795   :  { %953 = vsyncpa [#allocation6], 1 }
 0x796   :  { %954 = vsyncpa [#allocation4], 1 }

</bundles_post_ra>
